<compile_context>
chip_gen: v5e
topology: v5e:2x2
jax: 0.10.0
libtpu: 0.0.40
codegen_flags: <defaults>
</compile_context>

<pallas_src>
import jax
import jax.numpy as jnp
from jax.experimental import pallas as pl
from jax.experimental.pallas import tpu as pltpu


def _simple_shader_kernel(p2f_ref, bary_ref, fcol_ref, out_ref):
    # p2f_ref : (1, T) int32   nearest face id per pixel (-1 = background)
    # bary_ref: (3, T) f32     barycentric coords of nearest face
    # fcol_ref: (9, T) f32     [v0 rgb | v1 rgb | v2 rgb] of nearest face
    # out_ref : (4, T) f32     RGBA, channel-major
    valid = (p2f_ref[...] >= 0).astype(out_ref.dtype)      # (1, T)

    b = bary_ref[...]                                       # (3, T)
    c = fcol_ref[...]                                       # (9, T)

    # barycentric interpolation of the 3 vertex colors of the nearest face
    rgb = (b[0:1, :] * c[0:3, :]
           + b[1:2, :] * c[3:6, :]
           + b[2:3, :] * c[6:9, :])                          # (3, T)

    # hard_rgb_blend with background_color = [0, 0, 0]:
    # `valid` both masks the (clipped-gather) texel and is the alpha channel.
    out_ref[0:3, :] = rgb * valid
    out_ref[3:4, :] = valid


def _round_up(x, m):
    return ((x + m - 1) // m) * m


def simple_shader(pix_to_face, bary_coords, verts_colors, faces, *, tile_p=2048):
    """Pallas implementation of SimpleShader.forward.

    pix_to_face : (N, H, W, K) int32   (-1 = background)
    bary_coords : (N, H, W, K, 3) f32
    verts_colors: (V, 3) f32           (TexturesVertex-style vertex colors)
    faces       : (F, 3) int32
    returns     : (N, H, W, 4) f32 RGBA
    """
    N, H, W, K = pix_to_face.shape
    P = N * H * W

    # ---- glue (plain JAX): slice to nearest face + data-dependent gather ----
    p2f0 = pix_to_face[..., 0].reshape(P).astype(jnp.int32)          # (P,)
    bary0 = bary_coords[..., 0, :].reshape(P, 3).astype(jnp.float32)  # (P, 3)

    face_cols9 = verts_colors.astype(jnp.float32)[faces].reshape(-1, 9)  # (F, 9)
    fcol0 = face_cols9[jnp.clip(p2f0, 0)]                             # (P, 9)

    # channel-major (lane-dense) layout: pixels on the 128-lane axis
    p2f_cm = p2f0.reshape(1, P)
    bary_cm = bary0.T                                                 # (3, P)
    fcol_cm = fcol0.T                                                 # (9, P)

    # ---- tiling: big pixel tiles, pad P to a tile multiple ------------------
    tile_p = max(128, min(tile_p, _round_up(P, 128)))
    P_pad = _round_up(P, tile_p)
    pad = P_pad - P
    if pad:
        p2f_cm = jnp.pad(p2f_cm, ((0, 0), (0, pad)), constant_values=-1)
        bary_cm = jnp.pad(bary_cm, ((0, 0), (0, pad)))
        fcol_cm = jnp.pad(fcol_cm, ((0, 0), (0, pad)))

    grid = (P_pad // tile_p,)

    out_cm = pl.pallas_call(
        _simple_shader_kernel,
        out_shape=jax.ShapeDtypeStruct((4, P_pad), jnp.float32),
        grid_spec=pltpu.PrefetchScalarGridSpec(
            num_scalar_prefetch=0,
            grid=grid,
            in_specs=[
                pl.BlockSpec((1, tile_p), lambda i: (0, i)),
                pl.BlockSpec((3, tile_p), lambda i: (0, i)),
                pl.BlockSpec((9, tile_p), lambda i: (0, i)),
            ],
            out_specs=pl.BlockSpec((4, tile_p), lambda i: (0, i)),
        ),
        compiler_params=pltpu.CompilerParams(
            dimension_semantics=("parallel",),
            vmem_limit_bytes=32 * 1024 * 1024,
        ),
    )(p2f_cm, bary_cm, fcol_cm)

    # back to (N, H, W, 4)
    return out_cm[:, :P].T.reshape(N, H, W, 4)


def _reference(pix_to_face, bary_coords, verts_colors, faces):
    face_cols = verts_colors[faces]                              # (F, 3, 3)
    pix_cols = face_cols[jnp.clip(pix_to_face, 0)]               # (N,H,W,K,3,3)
    texels = jnp.einsum("nhwkv,nhwkvc->nhwkc", bary_coords, pix_cols)
    texels = jnp.where((pix_to_face >= 0)[..., None], texels, 0.0)
    is_bg = (pix_to_face[..., 0] < 0)[..., None]
    rgb = jnp.where(is_bg, 0.0, texels[..., 0, :])
    alpha = jnp.where(is_bg, 0.0, 1.0)
    return jnp.concatenate([rgb, alpha], axis=-1)


if __name__ == "__main__":
    key = jax.random.PRNGKey(0)
    k1, k2, k3, k4 = jax.random.split(key, 4)

    N, H, W, K = 2, 16, 16, 4     # small fragments buffer
    V, F = 32, 24                 # small synthetic mesh

    # synthetic mesh textures (TexturesVertex): per-vertex RGB in [0, 1]
    verts_colors = jax.random.uniform(k1, (V, 3), dtype=jnp.float32)
    faces = jax.random.randint(k2, (F, 3), 0, V, dtype=jnp.int32)

    # synthetic fragments: pix_to_face (-1 = background) and bary coords (sum to 1)
    pix_to_face = jax.random.randint(k3, (N, H, W, K), -1, F, dtype=jnp.int32)
    bary_raw = jax.random.uniform(k4, (N, H, W, K, 3), dtype=jnp.float32) + 1e-3
    bary_coords = bary_raw / jnp.sum(bary_raw, axis=-1, keepdims=True)

    images = simple_shader(pix_to_face, bary_coords, verts_colors, faces)
    images = jax.block_until_ready(images)

    ref = _reference(pix_to_face, bary_coords, verts_colors, faces)
    assert images.shape == (N, H, W, 4)
    assert jnp.allclose(images, ref, atol=1e-5, rtol=1e-5)

    print("KERNEL_OK")
</pallas_src>

<mosaic_0001>
module attributes {stable_mosaic.version = 11 : i64} {
  func.func @_simple_shader_kernel(%arg0: i32, %arg1: memref<1x512xi32, #tpu.memory_space<vmem>>, %arg2: memref<3x512xf32, #tpu.memory_space<vmem>>, %arg3: memref<9x512xf32, #tpu.memory_space<vmem>>, %arg4: memref<4x512xf32, #tpu.memory_space<vmem>>) attributes {dimension_semantics = [#tpu.dimension_semantics<parallel>], iteration_bounds = array<i64: 1>, scalar_prefetch = 0 : i64, scratch_operands = 0 : i64, tpu.core_type = #tpu.core_type<tc>, window_params = [{transform_indices = @transform_0, window_bounds = array<i64: 1, 512>}, {transform_indices = @transform_1, window_bounds = array<i64: 3, 512>}, {transform_indices = @transform_2, window_bounds = array<i64: 9, 512>}, {transform_indices = @transform_3, window_bounds = array<i64: 4, 512>}]} {
    %c0 = arith.constant 0 : index
    %c0_0 = arith.constant 0 : index
    %0 = vector.load %arg1[%c0, %c0_0] : memref<1x512xi32, #tpu.memory_space<vmem>>, vector<1x512xi32>
    %c0_i32 = arith.constant 0 : i32
    %1 = vector.broadcast %c0_i32 : i32 to vector<1x512xi32>
    %2 = arith.cmpi sge, %0, %1 : vector<1x512xi32>
    %3 = arith.extui %2 : vector<1x512xi1> to vector<1x512xi32>
    %4 = arith.sitofp %3 : vector<1x512xi32> to vector<1x512xf32>
    %c0_1 = arith.constant 0 : index
    %c0_2 = arith.constant 0 : index
    %5 = vector.load %arg2[%c0_1, %c0_2] : memref<3x512xf32, #tpu.memory_space<vmem>>, vector<3x512xf32>
    %c0_3 = arith.constant 0 : index
    %c0_4 = arith.constant 0 : index
    %6 = vector.load %arg3[%c0_3, %c0_4] : memref<9x512xf32, #tpu.memory_space<vmem>>, vector<9x512xf32>
    %7 = vector.extract_strided_slice %5 {offsets = [0, 0], sizes = [1, 512], strides = [1, 1]} : vector<3x512xf32> to vector<1x512xf32>
    %8 = vector.extract_strided_slice %6 {offsets = [0, 0], sizes = [3, 512], strides = [1, 1]} : vector<9x512xf32> to vector<3x512xf32>
    %9 = vector.broadcast %7 : vector<1x512xf32> to vector<3x512xf32>
    %10 = arith.mulf %9, %8 : vector<3x512xf32>
    %11 = vector.extract_strided_slice %5 {offsets = [1, 0], sizes = [1, 512], strides = [1, 1]} : vector<3x512xf32> to vector<1x512xf32>
    %12 = vector.extract_strided_slice %6 {offsets = [3, 0], sizes = [3, 512], strides = [1, 1]} : vector<9x512xf32> to vector<3x512xf32>
    %13 = vector.broadcast %11 : vector<1x512xf32> to vector<3x512xf32>
    %14 = arith.mulf %13, %12 : vector<3x512xf32>
    %15 = arith.addf %10, %14 : vector<3x512xf32>
    %16 = vector.extract_strided_slice %5 {offsets = [2, 0], sizes = [1, 512], strides = [1, 1]} : vector<3x512xf32> to vector<1x512xf32>
    %17 = vector.extract_strided_slice %6 {offsets = [6, 0], sizes = [3, 512], strides = [1, 1]} : vector<9x512xf32> to vector<3x512xf32>
    %18 = vector.broadcast %16 : vector<1x512xf32> to vector<3x512xf32>
    %19 = arith.mulf %18, %17 : vector<3x512xf32>
    %20 = arith.addf %15, %19 : vector<3x512xf32>
    %21 = vector.broadcast %4 : vector<1x512xf32> to vector<3x512xf32>
    %22 = arith.mulf %20, %21 : vector<3x512xf32>
    %c0_5 = arith.constant 0 : index
    %c0_6 = arith.constant 0 : index
    %23 = vector.load %arg4[%c0_5, %c0_6] : memref<4x512xf32, #tpu.memory_space<vmem>>, vector<3x512xf32>
    tpu.vector_store %arg4[%c0_5, %c0_6], %22 {strides = array<i32>} : memref<4x512xf32, #tpu.memory_space<vmem>>, vector<3x512xf32>,
    %c3 = arith.constant 3 : index
    %c0_7 = arith.constant 0 : index
    %24 = vector.load %arg4[%c3, %c0_7] : memref<4x512xf32, #tpu.memory_space<vmem>>, vector<1x512xf32>
    tpu.vector_store %arg4[%c3, %c0_7], %4 {strides = array<i32>} : memref<4x512xf32, #tpu.memory_space<vmem>>, vector<1x512xf32>,
    return
  }
  func.func @transform_0(%arg0: i32) -> (i32, i32) {
    %c0_i32 = arith.constant 0 : i32
    %c0_i32_0 = arith.constant 0 : i32
    return %c0_i32, %arg0 : i32, i32
  }
  func.func @transform_1(%arg0: i32) -> (i32, i32) {
    %c0_i32 = arith.constant 0 : i32
    %c0_i32_0 = arith.constant 0 : i32
    return %c0_i32, %arg0 : i32, i32
  }
  func.func @transform_2(%arg0: i32) -> (i32, i32) {
    %c0_i32 = arith.constant 0 : i32
    %c0_i32_0 = arith.constant 0 : i32
    return %c0_i32, %arg0 : i32, i32
  }
  func.func @transform_3(%arg0: i32) -> (i32, i32) {
    %c0_i32 = arith.constant 0 : i32
    %c0_i32_0 = arith.constant 0 : i32
    return %c0_i32, %arg0 : i32, i32
  }
}

</mosaic_0001>

<bundles_post_ra>
// kernel: tpu_custom_call.1
= control target key start
LH: loop header
LB: loop body
LE: loop exit
PB: predicated region body
PF: predicated region fallthrough
CT: control target
= control target key end

     0   :  { %8 = vsyncpa [#allocation3], 0  ;;  %s389_s0 = inlined_call_operand.hbm [shape: s32[1,512], index: 0, kind: input, shape index: {}]   ;;  %s390_s1 = inlined_call_operand.hbm [shape: f32[3,512], index: 1, kind: input, shape index: {}]   ;;  %s391_s2 = inlined_call_operand.hbm [shape: f32[9,512], index: 2, kind: input, shape index: {}]   ;;  %s392_s3 = inlined_call_operand.hbm [shape: f32[4,512], index: 3, kind: output, shape index: {}]  }
   0x1   :  { %9 = vsyncpa [#allocation6], 0  ;;  %s27_s14 = sshll.u32 %s390_s1, 4  ;;  %s28_s14 = int_to_ptr.hbm [resolvable:$true] %s27_s14 }
   0x2   :  { %10 = vsyncpa [#allocation4], 0  ;;  %s331_s15 = smov [#allocation5]   ;;  %s16_s19 = sshll.u32 %s389_s0, 4  ;;  %s17_s19 = int_to_ptr.hbm [resolvable:$true] %s16_s19 }
   0x3   :  { %s29_s16 = sshll.u32 %s331_s15, 4  ;;  %s332_s20 = smov [#allocation2]   ;;  %s30_s16 = int_to_ptr.vmem [resolvable:$true] %s29_s16 }
   0x4   :  { %32 = dma.hbm_to_vmem [thread:$0]  %s28_s14, 256, %s30_s16, [#allocation6]  }
   0x5   :  { %s18_s21 = sshll.u32 %s332_s20, 4  ;;  %s37_s24 = sshll.u32 %s391_s2, 4  ;;  %s19_s21 = int_to_ptr.vmem [resolvable:$true] %s18_s21  ;;  %s38_s24 = int_to_ptr.hbm [resolvable:$true] %s37_s24 }
   0x6   :  { %21 = dma.hbm_to_vmem [thread:$0]  %s17_s19, 64, %s19_s21, [#allocation3]  }
   0x7   :  { %s333_s1 = smov [#allocation7]   ;;  %s334_s26 = smov 512  }
   0x8   :  { %s39_s25 = sshll.u32 %s333_s1, 4  ;;  %s335_s27 = smov 32   ;;  %s40_s25 = int_to_ptr.vmem [resolvable:$true] %s39_s25 }
   0x9   :  { %45 = dma.hbm_to_vmem [thread:$0]  %s38_s24, 1024, %s40_s25, [#allocation6], %s334_s26, %s334_s26, %s335_s27  }
   0xa   :  { %325 = dma.done.wait [#allocation3], 64  }
   0xb   :  { %326 = vsyncadd [#allocation3], 4294967232 }
   0xc   :  { %327 = dma.done.wait [#allocation6], 1280  }
   0xd   :  { %328 = vsyncadd [#allocation6], 4294966016  ;;  %v197_v0 = vlaneseq  ;;  %v58_v1 = vld [vmem:[#allocation2] sm:$0xf]  ;;  %v62_v2 = vld [vmem:[#allocation5] sm:$0x77] }
   0xe   :  { %vm59_vm0 = vcmp.ge.s32.totalorder %v58_v1, 0  ;;  %vm150_vm1 = vcmask 1041408   ;;  %v64_v3 = vld [vmem:[#allocation7] sm:$0xff]  ;;  %v74_v4 = vperm.slane %v62_v2, 0  ;;  %v75_v5 = vperm.slane %v62_v2, 4  ;;  %v65_v8 = vld [vmem:[#allocation7 + $0x8] sm:$0xff] }
   0xf   :  { %v90_v6 = vperm.slane %v62_v2, 1  ;;  %vm367_vm2 = vcmp.lt.s32.totalorder %v197_v0, 512  ;;  %v68_v9 = vld [vmem:[#allocation7 + $0x20] sm:$0x1]  ;;  %v91_v10 = vperm.slane %v62_v2, 5  ;;  %v122_v11 = vperm.slane %v62_v2, 2 }
  0x10   :  { %v123_v12 = vperm.slane %v62_v2, 6  ;;  %v336_v13 = vmov 0.0   ;;  %v82_v15 = vperm.slane %v74_v4, 0  ;;  %v83_v16 = vperm.slane %v75_v5, 0  ;;  %v63_v18 = vld [vmem:[#allocation5 + $0x8] sm:$0x77] }
  0x11   :  { %v371_v14 = vsel %vm59_vm0, 1.0, %v336_v13  ;;  %v98_v17 = vperm.slane %v90_v6, 1  ;;  %v69_v19 = vld [vmem:[#allocation7 + $0x28] sm:$0x1]  ;;  %v99_v20 = vperm.slane %v91_v10, 1  ;;  %v130_v21 = vperm.slane %v122_v11, 2 }
  0x12   :  { %v131_v22 = vperm.slane %v123_v12, 2  ;;  %v76_v23 = vperm.slane %v63_v18, 0  ;;  %v86_v24 = vmul.f32 %v82_v15, %v64_v3  ;;  %v87_v25 = vmul.f32 %v83_v16, %v65_v8  ;;  %202 = vst.msk [vmem:[#allocation8 + $0x3] ss:$4 sm:$0xf] %vm367_vm2, %v371_v14  ;;  %v66_v50 = vld [vmem:[#allocation7 + $0x10] sm:$0xff] }
  0x13   :  { %v102_v26 = vmul.f32 %v98_v17, %v64_v3  ;;  %v77_v27 = vperm.slane %v63_v18, 4  ;;  %v103_v28 = vmul.f32 %v99_v20, %v65_v8  ;;  %v134_v29 = vmul.f32 %v130_v21, %v64_v3  ;;  %v67_v51 = vld [vmem:[#allocation7 + $0x18] sm:$0xff]  ;;  %v70_v55 = vld [vmem:[#allocation7 + $0x30] sm:$0x1]  ;;  %s337_s0 = smov [#allocation8]   ;;  %s210_s30 = sshll.u32 %s392_s3, 4  ;;  %s211_s30 = int_to_ptr.hbm [resolvable:$true] %s210_s30 }
  0x14   :  { %v135_v30 = vmul.f32 %v131_v22, %v65_v8  ;;  %v138_v31 = vmul.f32 %v130_v21, %v68_v9  ;;  %v139_v33 = vmul.f32 %v131_v22, %v69_v19  ;;  %v172_v34 = vperm.slane %v371_v14, 0  ;;  %v71_v56 = vld [vmem:[#allocation7 + $0x38] sm:$0x1]  ;;  %s208_s2 = sshll.u32 %s337_s0, 4  ;;  %s209_s2 = int_to_ptr.vmem [resolvable:$true] %s208_s2 }
  0x15   :  { %v110_v32 = vrot.slane %v102_v26, 3  ;;  %v173_v35 = vperm.slane %v371_v14, 1  ;;  %vm190_vm3 = vcmask 1043456   ;;  %v111_v36 = vrot.slane %v103_v28, 3 }
  0x16   :  { %v151_v37 = vrot.slane %v134_v29, 6  ;;  %v152_v38 = vrot.slane %v138_v31, 6  ;;  %v154_v39 = vrot.slane %v135_v30, 6  ;;  %v155_v41 = vrot.slane %v139_v33, 6 }
  0x17   :  { %v118_v40 = vadd.f32 %v110_v32, %v86_v24  ;;  %v84_v42 = vperm.slane %v76_v23, 0  ;;  %v85_v43 = vperm.slane %v77_v27, 0  ;;  %v119_v44 = vadd.f32 %v111_v36, %v87_v25 }
  0x18   :  { %v153_v45 = vsel %vm150_vm1, %v151_v37, %v152_v38  ;;  %v92_v46 = vperm.slane %v63_v18, 1  ;;  %v93_v47 = vperm.slane %v63_v18, 5  ;;  %v156_v48 = vsel %vm150_vm1, %v154_v39, %v155_v41 }
  0x19   :  { %v167_v49 = vadd.f32 %v153_v45, %v118_v40  ;;  %v124_v52 = vperm.slane %v63_v18, 2  ;;  %v125_v53 = vperm.slane %v63_v18, 6  ;;  %v168_v54 = vadd.f32 %v156_v48, %v119_v44 }
  0x1a   :  { %v100_v57 = vperm.slane %v92_v46, 1  ;;  %v101_v58 = vperm.slane %v93_v47, 1  ;;  %v88_v59 = vmul.f32 %v84_v42, %v66_v50  ;;  %v89_v60 = vmul.f32 %v85_v43, %v67_v51 }
  0x1b   :  { %v132_v61 = vperm.slane %v124_v52, 2  ;;  %v133_v62 = vperm.slane %v125_v53, 2  ;;  %v180_v63 = vmul.f32 %v172_v34, %v167_v49  ;;  %v181_v0 = vmul.f32 %v173_v35, %v168_v54 }
  0x1c   :  { %v104_v1 = vmul.f32 %v100_v57, %v66_v50  ;;  %v105_v2 = vmul.f32 %v101_v58, %v67_v51  ;;  %v174_v10 = vperm.slane %v371_v14, 2  ;;  %v175_v19 = vperm.slane %v371_v14, 3 }
  0x1d   :  { %v136_v3 = vmul.f32 %v132_v61, %v66_v50  ;;  %v137_v4 = vmul.f32 %v133_v62, %v67_v51  ;;  %v140_v5 = vmul.f32 %v132_v61, %v70_v55  ;;  %v141_v6 = vmul.f32 %v133_v62, %v71_v56 }
  0x1e   :  { %v188_v7 = vrot.slane %v181_v0, 4  ;;  %v112_v8 = vrot.slane %v104_v1, 3  ;;  %v113_v9 = vrot.slane %v105_v2, 3 }
  0x1f   :  { %v157_v11 = vrot.slane %v136_v3, 6  ;;  %v158_v12 = vrot.slane %v140_v5, 6  ;;  %v160_v13 = vrot.slane %v137_v4, 6  ;;  %v161_v15 = vrot.slane %v141_v6, 6 }
  0x20   :  { %v191_v16 = vsel %vm190_vm3, %v180_v63, %v188_v7  ;;  %v120_v17 = vadd.f32 %v112_v8, %v88_v59  ;;  %v121_v18 = vadd.f32 %v113_v9, %v89_v60 }
  0x21   :  { %195 = vst [vmem:[#allocation8] sm:$0x77] %v191_v16  ;;  %v159_v20 = vsel %vm150_vm1, %v157_v11, %v158_v12  ;;  %v162_v21 = vsel %vm150_vm1, %v160_v13, %v161_v15 }
  0x22   :  { %v169_v22 = vadd.f32 %v159_v20, %v120_v17  ;;  %v170_v23 = vadd.f32 %v162_v21, %v121_v18 }
  0x24   :  { %v182_v24 = vmul.f32 %v174_v10, %v169_v22  ;;  %v183_v25 = vmul.f32 %v175_v19, %v170_v23 }
  0x26   :  { %v189_v26 = vrot.slane %v183_v25, 4 }
  0x28   :  { %v192_v14 = vsel %vm190_vm3, %v182_v24, %v189_v26 }
  0x29   :  { %196 = vst [vmem:[#allocation8 + $0x8] sm:$0x77] %v192_v14 }
  0x2a   :  { %213 = dma.vmem_to_hbm [thread:$0]  %s209_s2, 256, %s211_s30, [#allocation4]  }
  0x2b   :  { %329 = dma.done.wait [#allocation4], 256  }
  0x2c   :  { %330 = vsyncadd [#allocation4], 4294967040 }
  0x2d   :  { %218 = vsyncpa [#allocation3], 1 }
  0x2e   :  { %219 = vsyncpa [#allocation6], 1 }
  0x2f   :  { %220 = vsyncpa [#allocation4], 1 }

</bundles_post_ra>
